<compile_context>
chip_gen: v7x
topology: tpu7x:2x2x1
jax: 0.10.0
libtpu: 0.0.40
codegen_flags: <defaults>
</compile_context>

<pallas_src>
import jax
import jax.numpy as jnp
from jax import lax
from jax.experimental import pallas as pl
from jax.experimental.pallas import tpu as pltpu


# ----------------------------- Pallas kernel ---------------------------------
def mixed_op_kernel(x_ref, m1_ref, b1_ref, m2_ref, b2_ref, o_ref):
    """One batch element per grid step.  Packed layout: (H, W*C), lane = W*C."""
    _, H, WC = x_ref.shape

    x = x_ref[0]                                        # (H, WC) f32, ~2 vregs

    # Row masks for the H (sublane) taps of the 3x3 conv (zero padding at edges).
    row = lax.broadcasted_iota(jnp.int32, (H, WC), 0)
    not_first = row >= 1          # rows where reading h-1 is in range
    not_last = row <= H - 2       # rows where reading h+1 is in range

    def sep_layer(y, m_ref, b_ref):
        # m_ref: (3, WC, WC). m_ref[kh] folds dwconv tap row kh, the 1x1 conv
        # and the BN scale into one banded matrix (W-edge padding pre-zeroed).
        y = jnp.maximum(y, 0.0)                                       # ReLU (VPU)
        y_up = jnp.where(not_first, pltpu.roll(y, 1, 0), 0.0)         # y[h-1] (XLU)
        y_dn = jnp.where(not_last, pltpu.roll(y, H - 1, 0), 0.0)      # y[h+1] (XLU)
        z = jnp.dot(y_up, m_ref[0], preferred_element_type=jnp.float32)
        z = z + jnp.dot(y, m_ref[1], preferred_element_type=jnp.float32)
        z = z + jnp.dot(y_dn, m_ref[2], preferred_element_type=jnp.float32)
        return z + b_ref[...]                                         # BN bias row

    # ---- sep_conv_3x3 branch (two depthwise-separable blocks) ----
    y = sep_layer(x, m1_ref, b1_ref)
    y = sep_layer(y, m2_ref, b2_ref)

    # ---- skip_connect (identity) + sum over ops; single full-width store ----
    o_ref[0] = (y + x).astype(o_ref.dtype)


# --------------------------- host-side packing --------------------------------
def pack_operands(p, C, H, W):
    """Fold PyTorch-layout weights into banded MXU matrices + bias rows."""
    WC = W * C

    def pack_layer(dw, pw, s):                       # dw (C,1,3,3), pw (C,C,1,1), s (C,)
        P = pw[:, :, 0, 0].T * s[None, :]            # (Cin, Cout), BN scale folded
        mats = []
        for kh in range(3):                          # vertical tap: kh=0 reads h-1
            M = jnp.zeros((WC, WC), P.dtype)
            for kw in range(3):                      # horizontal tap ew = kw-1
                ew = kw - 1
                blk = dw[:, 0, kh, kw][:, None] * P  # (Cin, Cout)
                shift = jnp.eye(W, dtype=P.dtype, k=-ew)   # Shift[w+ew, w] = 1 (edges drop)
                M = M + jnp.kron(shift, blk)         # banded block matrix (WC, WC)
            mats.append(M)
        return jnp.stack(mats, 0)                    # (3, WC, WC)

    def pack_b(b):
        return jnp.tile(b, W).reshape(1, WC)         # lane order w*C + c

    return (pack_layer(p["dw1"], p["pw1"], p["s1"]), pack_b(p["b1"]),
            pack_layer(p["dw2"], p["pw2"], p["s2"]), pack_b(p["b2"]))


@jax.jit
def mixed_op_forward(x_nchw, params):
    N, C, H, W = x_nchw.shape
    WC = W * C
    # Layout plumbing (NCHW -> lane-dense packed) stays in the JAX wrapper.
    x_p = jnp.transpose(x_nchw, (0, 2, 3, 1)).reshape(N, H, WC)
    m1, b1, m2, b2 = pack_operands(params, C, H, W)

    grid_spec = pltpu.PrefetchScalarGridSpec(
        num_scalar_prefetch=0,
        grid=(N,),
        in_specs=[
            pl.BlockSpec((1, H, WC), lambda n: (n, 0, 0)),    # x (per batch element)
            pl.BlockSpec((3, WC, WC), lambda n: (0, 0, 0)),   # layer-1 banded matrices
            pl.BlockSpec((1, WC), lambda n: (0, 0)),          # layer-1 BN bias row
            pl.BlockSpec((3, WC, WC), lambda n: (0, 0, 0)),   # layer-2 banded matrices
            pl.BlockSpec((1, WC), lambda n: (0, 0)),          # layer-2 BN bias row
        ],
        out_specs=pl.BlockSpec((1, H, WC), lambda n: (n, 0, 0)),
    )
    out_p = pl.pallas_call(
        mixed_op_kernel,
        out_shape=jax.ShapeDtypeStruct((N, H, WC), x_nchw.dtype),
        grid_spec=grid_spec,
        # "parallel": batch elements shard across the 2 TensorCores on v7x;
        # no-op on single-TC v5e/v6e (weight block indices unchanged -> no re-DMA).
        compiler_params=pltpu.CompilerParams(dimension_semantics=("parallel",)),
    )(x_p, m1, b1, m2, b2)

    return jnp.transpose(out_p.reshape(N, H, W, C), (0, 3, 1, 2))


# ------------------------- pure-JAX reference (NCHW) --------------------------
def mixed_op_ref(x, p):
    C = x.shape[1]

    def dwconv(y, w):
        return lax.conv_general_dilated(
            y, w, (1, 1), "SAME",
            dimension_numbers=("NCHW", "OIHW", "NCHW"),
            feature_group_count=C, precision=lax.Precision.HIGHEST)

    def pwconv(y, w):
        return lax.conv_general_dilated(
            y, w, (1, 1), "SAME",
            dimension_numbers=("NCHW", "OIHW", "NCHW"),
            precision=lax.Precision.HIGHEST)

    y = jax.nn.relu(x)
    y = dwconv(y, p["dw1"])
    y = pwconv(y, p["pw1"])
    y = y * p["s1"][None, :, None, None] + p["b1"][None, :, None, None]
    y = jax.nn.relu(y)
    y = dwconv(y, p["dw2"])
    y = pwconv(y, p["pw2"])
    y = y * p["s2"][None, :, None, None] + p["b2"][None, :, None, None]
    return y + x


# ------------------------- parameter construction ----------------------------
def make_params(key, C):
    ks = jax.random.split(key, 12)
    eps = 1e-5

    def fold_bn(kg, kb, km, kv):
        gamma = jax.random.uniform(kg, (C,), jnp.float32, 0.8, 1.2)
        beta = 0.1 * jax.random.normal(kb, (C,), jnp.float32)
        mean = 0.1 * jax.random.normal(km, (C,), jnp.float32)
        var = jax.random.uniform(kv, (C,), jnp.float32, 0.5, 1.5)
        s = gamma / jnp.sqrt(var + eps)
        b = beta - mean * s
        return s, b

    s1, b1 = fold_bn(ks[2], ks[3], ks[4], ks[5])
    s2, b2 = fold_bn(ks[8], ks[9], ks[10], ks[11])
    return {
        # PyTorch layouts: depthwise (C,1,3,3) OIHW groups=C; pointwise (C,C,1,1)
        "dw1": 0.2 * jax.random.normal(ks[0], (C, 1, 3, 3), jnp.float32),
        "pw1": 0.3 * jax.random.normal(ks[1], (C, C, 1, 1), jnp.float32),
        "s1": s1, "b1": b1,
        "dw2": 0.2 * jax.random.normal(ks[6], (C, 1, 3, 3), jnp.float32),
        "pw2": 0.3 * jax.random.normal(ks[7], (C, C, 1, 1), jnp.float32),
        "s2": s2, "b2": b2,
    }


if __name__ == "__main__":
    N, C, H, W = 2, 8, 16, 16       # PyTorch NCHW input (2, 8, 16, 16)
    key = jax.random.PRNGKey(0)
    k_x, k_p = jax.random.split(key)
    x = jax.random.normal(k_x, (N, C, H, W), jnp.float32)
    params = make_params(k_p, C)

    out = mixed_op_forward(x, params)
    out = jax.block_until_ready(out)

    ref = mixed_op_ref(x, params)
    assert out.shape == ref.shape and out.dtype == ref.dtype
    assert jnp.allclose(out, ref, rtol=1e-4, atol=1e-4), \
        f"max abs err {jnp.max(jnp.abs(out - ref))}"

    print("KERNEL_OK")
</pallas_src>

<mosaic_0001>
module attributes {stable_mosaic.version = 11 : i64} {
  func.func @mixed_op_kernel(%arg0: i32, %arg1: memref<1x16x128xf32, #tpu.memory_space<vmem>>, %arg2: memref<3x128x128xf32, #tpu.memory_space<vmem>>, %arg3: memref<1x128xf32, #tpu.memory_space<vmem>>, %arg4: memref<3x128x128xf32, #tpu.memory_space<vmem>>, %arg5: memref<1x128xf32, #tpu.memory_space<vmem>>, %arg6: memref<1x16x128xf32, #tpu.memory_space<vmem>>) attributes {dimension_semantics = [#tpu.dimension_semantics<parallel>], iteration_bounds = array<i64: 2>, scalar_prefetch = 0 : i64, scratch_operands = 0 : i64, tpu.core_type = #tpu.core_type<tc>, window_params = [{transform_indices = @transform_0, window_bounds = array<i64: 1, 16, 128>}, {pipeline_mode = #tpu.pipeline_mode<synchronous>, transform_indices = @transform_1, window_bounds = array<i64: 3, 128, 128>}, {pipeline_mode = #tpu.pipeline_mode<synchronous>, transform_indices = @transform_2, window_bounds = array<i64: 1, 128>}, {pipeline_mode = #tpu.pipeline_mode<synchronous>, transform_indices = @transform_3, window_bounds = array<i64: 3, 128, 128>}, {pipeline_mode = #tpu.pipeline_mode<synchronous>, transform_indices = @transform_4, window_bounds = array<i64: 1, 128>}, {transform_indices = @transform_5, window_bounds = array<i64: 1, 16, 128>}]} {
    %c0 = arith.constant 0 : index
    %c0_0 = arith.constant 0 : index
    %c0_1 = arith.constant 0 : index
    %0 = vector.load %arg1[%c0, %c0_0, %c0_1] : memref<1x16x128xf32, #tpu.memory_space<vmem>>, vector<1x16x128xf32>
    %1 = vector.shape_cast %0 : vector<1x16x128xf32> to vector<16x128xf32>
    %2 = tpu.iota {dimensions = array<i32: 0>} : vector<16x128xi32>
    %c1_i32 = arith.constant 1 : i32
    %3 = vector.broadcast %c1_i32 : i32 to vector<16x128xi32>
    %4 = arith.cmpi sge, %2, %3 : vector<16x128xi32>
    %c14_i32 = arith.constant 14 : i32
    %5 = vector.broadcast %c14_i32 : i32 to vector<16x128xi32>
    %6 = arith.cmpi sle, %2, %5 : vector<16x128xi32>
    %cst = arith.constant 0.000000e+00 : f32
    %7 = vector.broadcast %cst : f32 to vector<16x128xf32>
    %8 = arith.maximumf %1, %7 : vector<16x128xf32>
    %c1_i32_2 = arith.constant 1 : i32
    %9 = tpu.dynamic_rotate %8 by %c1_i32_2 dim 0 : vector<16x128xf32>, i32 -> vector<16x128xf32>
    %cst_3 = arith.constant 0.000000e+00 : f32
    %10 = vector.broadcast %cst_3 : f32 to vector<16x128xf32>
    %11 = arith.select %4, %9, %10 : vector<16x128xi1>, vector<16x128xf32>
    %c15_i32 = arith.constant 15 : i32
    %12 = tpu.dynamic_rotate %8 by %c15_i32 dim 0 : vector<16x128xf32>, i32 -> vector<16x128xf32>
    %cst_4 = arith.constant 0.000000e+00 : f32
    %13 = vector.broadcast %cst_4 : f32 to vector<16x128xf32>
    %14 = arith.select %6, %12, %13 : vector<16x128xi1>, vector<16x128xf32>
    %c0_5 = arith.constant 0 : index
    %c0_6 = arith.constant 0 : index
    %c0_7 = arith.constant 0 : index
    %15 = vector.load %arg2[%c0_5, %c0_6, %c0_7] : memref<3x128x128xf32, #tpu.memory_space<vmem>>, vector<1x128x128xf32>
    %16 = vector.shape_cast %15 : vector<1x128x128xf32> to vector<128x128xf32>
    %cst_8 = arith.constant dense<0.000000e+00> : vector<16x128xf32>
    %17 = tpu.matmul %11, %16, %cst_8 {dimension_numbers = #tpu.dot_dimension_numbers<[1], [0], [0], [1], [0, 0, 1, 1], [], []>} : vector<16x128xf32>, vector<128x128xf32>, vector<16x128xf32> -> vector<16x128xf32>
    %c1 = arith.constant 1 : index
    %c0_9 = arith.constant 0 : index
    %c0_10 = arith.constant 0 : index
    %18 = vector.load %arg2[%c1, %c0_9, %c0_10] : memref<3x128x128xf32, #tpu.memory_space<vmem>>, vector<1x128x128xf32>
    %19 = vector.shape_cast %18 : vector<1x128x128xf32> to vector<128x128xf32>
    %cst_11 = arith.constant dense<0.000000e+00> : vector<16x128xf32>
    %20 = tpu.matmul %8, %19, %cst_11 {dimension_numbers = #tpu.dot_dimension_numbers<[1], [0], [0], [1], [0, 0, 1, 1], [], []>} : vector<16x128xf32>, vector<128x128xf32>, vector<16x128xf32> -> vector<16x128xf32>
    %21 = arith.addf %17, %20 : vector<16x128xf32>
    %c2 = arith.constant 2 : index
    %c0_12 = arith.constant 0 : index
    %c0_13 = arith.constant 0 : index
    %22 = vector.load %arg2[%c2, %c0_12, %c0_13] : memref<3x128x128xf32, #tpu.memory_space<vmem>>, vector<1x128x128xf32>
    %23 = vector.shape_cast %22 : vector<1x128x128xf32> to vector<128x128xf32>
    %cst_14 = arith.constant dense<0.000000e+00> : vector<16x128xf32>
    %24 = tpu.matmul %14, %23, %cst_14 {dimension_numbers = #tpu.dot_dimension_numbers<[1], [0], [0], [1], [0, 0, 1, 1], [], []>} : vector<16x128xf32>, vector<128x128xf32>, vector<16x128xf32> -> vector<16x128xf32>
    %25 = arith.addf %21, %24 : vector<16x128xf32>
    %c0_15 = arith.constant 0 : index
    %c0_16 = arith.constant 0 : index
    %26 = vector.load %arg3[%c0_15, %c0_16] : memref<1x128xf32, #tpu.memory_space<vmem>>, vector<1x128xf32>
    %27 = vector.broadcast %26 : vector<1x128xf32> to vector<16x128xf32>
    %28 = arith.addf %25, %27 : vector<16x128xf32>
    %cst_17 = arith.constant 0.000000e+00 : f32
    %29 = vector.broadcast %cst_17 : f32 to vector<16x128xf32>
    %30 = arith.maximumf %28, %29 : vector<16x128xf32>
    %c1_i32_18 = arith.constant 1 : i32
    %31 = tpu.dynamic_rotate %30 by %c1_i32_18 dim 0 : vector<16x128xf32>, i32 -> vector<16x128xf32>
    %cst_19 = arith.constant 0.000000e+00 : f32
    %32 = vector.broadcast %cst_19 : f32 to vector<16x128xf32>
    %33 = arith.select %4, %31, %32 : vector<16x128xi1>, vector<16x128xf32>
    %c15_i32_20 = arith.constant 15 : i32
    %34 = tpu.dynamic_rotate %30 by %c15_i32_20 dim 0 : vector<16x128xf32>, i32 -> vector<16x128xf32>
    %cst_21 = arith.constant 0.000000e+00 : f32
    %35 = vector.broadcast %cst_21 : f32 to vector<16x128xf32>
    %36 = arith.select %6, %34, %35 : vector<16x128xi1>, vector<16x128xf32>
    %c0_22 = arith.constant 0 : index
    %c0_23 = arith.constant 0 : index
    %c0_24 = arith.constant 0 : index
    %37 = vector.load %arg4[%c0_22, %c0_23, %c0_24] : memref<3x128x128xf32, #tpu.memory_space<vmem>>, vector<1x128x128xf32>
    %38 = vector.shape_cast %37 : vector<1x128x128xf32> to vector<128x128xf32>
    %cst_25 = arith.constant dense<0.000000e+00> : vector<16x128xf32>
    %39 = tpu.matmul %33, %38, %cst_25 {dimension_numbers = #tpu.dot_dimension_numbers<[1], [0], [0], [1], [0, 0, 1, 1], [], []>} : vector<16x128xf32>, vector<128x128xf32>, vector<16x128xf32> -> vector<16x128xf32>
    %c1_26 = arith.constant 1 : index
    %c0_27 = arith.constant 0 : index
    %c0_28 = arith.constant 0 : index
    %40 = vector.load %arg4[%c1_26, %c0_27, %c0_28] : memref<3x128x128xf32, #tpu.memory_space<vmem>>, vector<1x128x128xf32>
    %41 = vector.shape_cast %40 : vector<1x128x128xf32> to vector<128x128xf32>
    %cst_29 = arith.constant dense<0.000000e+00> : vector<16x128xf32>
    %42 = tpu.matmul %30, %41, %cst_29 {dimension_numbers = #tpu.dot_dimension_numbers<[1], [0], [0], [1], [0, 0, 1, 1], [], []>} : vector<16x128xf32>, vector<128x128xf32>, vector<16x128xf32> -> vector<16x128xf32>
    %43 = arith.addf %39, %42 : vector<16x128xf32>
    %c2_30 = arith.constant 2 : index
    %c0_31 = arith.constant 0 : index
    %c0_32 = arith.constant 0 : index
    %44 = vector.load %arg4[%c2_30, %c0_31, %c0_32] : memref<3x128x128xf32, #tpu.memory_space<vmem>>, vector<1x128x128xf32>
    %45 = vector.shape_cast %44 : vector<1x128x128xf32> to vector<128x128xf32>
    %cst_33 = arith.constant dense<0.000000e+00> : vector<16x128xf32>
    %46 = tpu.matmul %36, %45, %cst_33 {dimension_numbers = #tpu.dot_dimension_numbers<[1], [0], [0], [1], [0, 0, 1, 1], [], []>} : vector<16x128xf32>, vector<128x128xf32>, vector<16x128xf32> -> vector<16x128xf32>
    %47 = arith.addf %43, %46 : vector<16x128xf32>
    %c0_34 = arith.constant 0 : index
    %c0_35 = arith.constant 0 : index
    %48 = vector.load %arg5[%c0_34, %c0_35] : memref<1x128xf32, #tpu.memory_space<vmem>>, vector<1x128xf32>
    %49 = vector.broadcast %48 : vector<1x128xf32> to vector<16x128xf32>
    %50 = arith.addf %47, %49 : vector<16x128xf32>
    %51 = arith.addf %50, %1 : vector<16x128xf32>
    %c0_36 = arith.constant 0 : index
    %c0_37 = arith.constant 0 : index
    %c0_38 = arith.constant 0 : index
    %52 = vector.load %arg6[%c0_36, %c0_37, %c0_38] : memref<1x16x128xf32, #tpu.memory_space<vmem>>, vector<1x16x128xf32>
    %53 = vector.shape_cast %52 : vector<1x16x128xf32> to vector<16x128xf32>
    %54 = vector.shape_cast %51 : vector<16x128xf32> to vector<1x16x128xf32>
    tpu.vector_store %arg6[%c0_36, %c0_37, %c0_38], %54 {strides = array<i32>} : memref<1x16x128xf32, #tpu.memory_space<vmem>>, vector<1x16x128xf32>,
    return
  }
  func.func @transform_0(%arg0: i32) -> (i32, i32, i32) {
    %c0_i32 = arith.constant 0 : i32
    %c0_i32_0 = arith.constant 0 : i32
    %c0_i32_1 = arith.constant 0 : i32
    return %arg0, %c0_i32, %c0_i32_0 : i32, i32, i32
  }
  func.func @transform_1(%arg0: i32) -> (i32, i32, i32) {
    %c0_i32 = arith.constant 0 : i32
    %c0_i32_0 = arith.constant 0 : i32
    %c0_i32_1 = arith.constant 0 : i32
    %c0_i32_2 = arith.constant 0 : i32
    return %c0_i32, %c0_i32_0, %c0_i32_1 : i32, i32, i32
  }
  func.func @transform_2(%arg0: i32) -> (i32, i32) {
    %c0_i32 = arith.constant 0 : i32
    %c0_i32_0 = arith.constant 0 : i32
    %c0_i32_1 = arith.constant 0 : i32
    return %c0_i32, %c0_i32_0 : i32, i32
  }
  func.func @transform_3(%arg0: i32) -> (i32, i32, i32) {
    %c0_i32 = arith.constant 0 : i32
    %c0_i32_0 = arith.constant 0 : i32
    %c0_i32_1 = arith.constant 0 : i32
    %c0_i32_2 = arith.constant 0 : i32
    return %c0_i32, %c0_i32_0, %c0_i32_1 : i32, i32, i32
  }
  func.func @transform_4(%arg0: i32) -> (i32, i32) {
    %c0_i32 = arith.constant 0 : i32
    %c0_i32_0 = arith.constant 0 : i32
    %c0_i32_1 = arith.constant 0 : i32
    return %c0_i32, %c0_i32_0 : i32, i32
  }
  func.func @transform_5(%arg0: i32) -> (i32, i32, i32) {
    %c0_i32 = arith.constant 0 : i32
    %c0_i32_0 = arith.constant 0 : i32
    %c0_i32_1 = arith.constant 0 : i32
    return %arg0, %c0_i32, %c0_i32_0 : i32, i32, i32
  }
}

</mosaic_0001>

<bundles_post_ra>
// kernel: tile.13
= control target key start
LH: loop header
LB: loop body
LE: loop exit
PB: predicated region body
PF: predicated region fallthrough
CT: control target
= control target key end

     0   :  { %s28_s0 = inlined_call_operand.vmem [shape: f32[8], index: 0, kind: input, shape index: {}]   ;;  %s29_s1 = inlined_call_operand.vmem [shape: f32[16,8], index: 1, kind: output, shape index: {}]  }
   0x1   :  { %v4_v0 = vld [vmem:[%s28_s0] ss:$0 sm:$0xff] }
   0x2   :  { %5 = vst [vmem:[%s29_s1] sm:$0xff] %v4_v0  ;;  %8 = vst [vmem:[%s29_s1 + $0x8] sm:$0xff] %v4_v0 }

// kernel: tile.14
= control target key start
LH: loop header
LB: loop body
LE: loop exit
PB: predicated region body
PF: predicated region fallthrough
CT: control target
= control target key end

     0   :  { %s131_s10 = smov 120   ;;  %s132_s11 = smov 104   ;;  %vm3_vm0 = vcmask 64512   ;;  %vm9_vm1 = vcmask 1048512   ;;  %vm15_vm2 = vcmask 982912   ;;  %vm21_vm3 = vcmask 917312   ;;  %s207_s0 = inlined_call_operand.vmem [shape: f32[16,8], index: 0, kind: input, shape index: {}]   ;;  %s208_s1 = inlined_call_operand.vmem [shape: f32[1,128], index: 1, kind: output, shape index: {}]  }
   0x1   :  { %v101_v0 = vld [vmem:[%s207_s0 + $0xf] sm:$0x1]   ;;  %v103_v1 = vld [vmem:[%s207_s0 + $0xd] sm:$0x1]   ;;  %v102_v2 = vld [vmem:[%s207_s0 + $0xe] sm:$0x1]  }
   0x2   :  { %7 = vrot.lane.b32.xlu0 %v101_v0, %s131_s10  ;;  %19 = vrot.lane.b32.xlu1 %v103_v1, %s132_s11  ;;  %v104_v3 = vld [vmem:[%s207_s0 + $0xc] sm:$0x1]   ;;  %s133_s16 = smov 112   ;;  %s134_s17 = smov 96   ;;  %v105_v4 = vld [vmem:[%s207_s0 + $0xb] sm:$0x1]  }
   0x3   :  { %v106_v5 = vld [vmem:[%s207_s0 + $0xa] sm:$0x1]   ;;  %v2_v6 = vld [vmem:[%s207_s0] sm:$0x1]   ;;  %s135_s24 = smov 88   ;;  %s136_s25 = smov 80  }
   0x4   :  { %4 = vst.msk [vmem:[#allocation0] sm:$0x1] %vm3_vm0, %v2_v6   ;;  %v107_v7 = vld [vmem:[%s207_s0 + $0x9] sm:$0x1]   ;;  %v108_v8 = vld [vmem:[%s207_s0 + $0x8] sm:$0x1]  }
   0x5   :  { %s137_s30 = smov 72   ;;  %s138_s2 = smov 64   ;;  %v109_v9 = vld [vmem:[%s207_s0 + $0x7] sm:$0x1]   ;;  %v110_v10 = vld [vmem:[%s207_s0 + $0x6] sm:$0x1]  }
   0x6   :  { %13 = vrot.lane.b32.xlu0 %v102_v2, %s133_s16  ;;  %25 = vrot.lane.b32.xlu1 %v104_v3, %s134_s17  ;;  %s139_s7 = smov 56   ;;  %s140_s8 = smov 48   ;;  %v111_v11 = vld [vmem:[%s207_s0 + $0x5] sm:$0x1]   ;;  %v112_v12 = vld [vmem:[%s207_s0 + $0x4] sm:$0x1]  }
   0x7   :  { %s141_s13 = smov 40   ;;  %s142_s14 = smov 32   ;;  %v113_v13 = vld [vmem:[%s207_s0 + $0x3] sm:$0x1]   ;;  %v114_v14 = vld [vmem:[%s207_s0 + $0x2] sm:$0x1]  }
   0x8   :  { %s143_s19 = smov 24   ;;  %s144_s20 = smov 16   ;;  %v115_v15 = vld [vmem:[%s207_s0 + $0x1] sm:$0x1]   ;;  %vm27_vm4 = vcmask 851712   ;;  %vm33_vm5 = vcmask 786112  }
   0x9   :  { %s145_s0 = smov 8   ;;  %vm39_vm6 = vcmask 720512   ;;  %vm45_vm7 = vcmask 654912   ;;  %vm51_vm8 = vcmask 589312   ;;  %vm57_vm9 = vcmask 523712  }
   0xa   :  { %31 = vrot.lane.b32.xlu0 %v105_v4, %s135_s24  ;;  %37 = vrot.lane.b32.xlu1 %v106_v5, %s136_s25  ;;  %vm63_vm10 = vcmask 458112   ;;  %vm69_vm11 = vcmask 392512   ;;  %vm75_vm12 = vcmask 326912   ;;  %vm81_vm13 = vcmask 261312  }
   0xb   :  { %vm87_vm14 = vcmask 195712   ;;  %vm93_vm15 = vcmask 130112  }
   0xe   :  { %43 = vrot.lane.b32.xlu0 %v107_v7, %s137_s30  ;;  %49 = vrot.lane.b32.xlu1 %v108_v8, %s138_s2 }
  0x12   :  { %55 = vrot.lane.b32.xlu0 %v109_v9, %s139_s7  ;;  %61 = vrot.lane.b32.xlu1 %v110_v10, %s140_s8 }
  0x16   :  { %67 = vrot.lane.b32.xlu0 %v111_v11, %s141_s13  ;;  %73 = vrot.lane.b32.xlu1 %v112_v12, %s142_s14 }
  0x1a   :  { %79 = vrot.lane.b32.xlu0 %v113_v13, %s143_s19  ;;  %85 = vrot.lane.b32.xlu1 %v114_v14, %s144_s20 }
  0x1e   :  { %91 = vrot.lane.b32.xlu0 %v115_v15, %s145_s0 }
  0x74   :  { %v8_v16 = vpop.permute.xlu0 %7   ;;  %v20_v17 = vpop.permute.xlu1 %19  }
  0x75   :  { %10 = vst.msk [vmem:[#allocation0] sm:$0x1] %vm9_vm1, %v8_v16  }
  0x78   :  { %v14_v18 = vpop.permute.xlu0 %13   ;;  %v26_v19 = vpop.permute.xlu1 %25  }
  0x79   :  { %16 = vst.msk [vmem:[#allocation0] sm:$0x1] %vm15_vm2, %v14_v18  }
  0x7a   :  { %22 = vst.msk [vmem:[#allocation0] sm:$0x1] %vm21_vm3, %v20_v17  }
  0x7b   :  { %28 = vst.msk [vmem:[#allocation0] sm:$0x1] %vm27_vm4, %v26_v19  }
  0x7c   :  { %v32_v20 = vpop.permute.xlu0 %31   ;;  %v38_v21 = vpop.permute.xlu1 %37  }
  0x7d   :  { %34 = vst.msk [vmem:[#allocation0] sm:$0x1] %vm33_vm5, %v32_v20  }
  0x7e   :  { %40 = vst.msk [vmem:[#allocation0] sm:$0x1] %vm39_vm6, %v38_v21  }
  0x80   :  { %v44_v22 = vpop.permute.xlu0 %43   ;;  %v50_v23 = vpop.permute.xlu1 %49  }
  0x81   :  { %46 = vst.msk [vmem:[#allocation0] sm:$0x1] %vm45_vm7, %v44_v22  }
  0x82   :  { %52 = vst.msk [vmem:[#allocation0] sm:$0x1] %vm51_vm8, %v50_v23  }
  0x84   :  { %v56_v24 = vpop.permute.xlu0 %55   ;;  %v62_v25 = vpop.permute.xlu1 %61  }
  0x85   :  { %58 = vst.msk [vmem:[#allocation0] sm:$0x1] %vm57_vm9, %v56_v24  }
  0x86   :  { %64 = vst.msk [vmem:[#allocation0] sm:$0x1] %vm63_vm10, %v62_v25  }
  0x88   :  { %v68_v26 = vpop.permute.xlu0 %67   ;;  %v74_v27 = vpop.permute.xlu1 %73  }
  0x89   :  { %70 = vst.msk [vmem:[#allocation0] sm:$0x1] %vm69_vm11, %v68_v26  }
  0x8a   :  { %76 = vst.msk [vmem:[#allocation0] sm:$0x1] %vm75_vm12, %v74_v27  }
  0x8c   :  { %v80_v28 = vpop.permute.xlu0 %79   ;;  %v86_v29 = vpop.permute.xlu1 %85  }
  0x8d   :  { %82 = vst.msk [vmem:[#allocation0] sm:$0x1] %vm81_vm13, %v80_v28  }
  0x8e   :  { %88 = vst.msk [vmem:[#allocation0] sm:$0x1] %vm87_vm14, %v86_v29  }
  0x90   :  { %v92_v30 = vpop.permute.xlu0 %91  }
  0x91   :  { %94 = vst.msk [vmem:[#allocation0] sm:$0x1] %vm93_vm15, %v92_v30  }
  0x98   :  { %v98_v31 = vld [vmem:[#allocation0] sm:$0x1] }
  0x99   :  { %100 = vst [vmem:[%s208_s1] sm:$0x1] %v98_v31 }

// kernel: mixed_op_forward.1
= control target key start
LH: loop header
LB: loop body
LE: loop exit
PB: predicated region body
PF: predicated region fallthrough
CT: control target
= control target key end

     0   :  { %s1542_s18 = smov 0   ;;  %s1926_s0 = inlined_call_operand.vmem [shape: f32[2,16,128], index: 0, kind: input, shape index: {}]   ;;  %s1927_s1 = inlined_call_operand.vmem [shape: f32[3,128,128], index: 1, kind: input, shape index: {}]   ;;  %s1928_s2 = inlined_call_operand.vmem [shape: f32[1,128], index: 2, kind: input, shape index: {}]   ;;  %s1929_s3 = inlined_call_operand.vmem [shape: f32[3,128,128], index: 3, kind: input, shape index: {}]   ;;  %s1930_s4 = inlined_call_operand.vmem [shape: f32[1,128], index: 4, kind: input, shape index: {}]   ;;  %s1931_s5 = inlined_call_operand.vmem [shape: f32[2,16,128], index: 5, kind: output, shape index: {}]  }
   0x1 LB: > { %s895_s19 = sadd.s32 4294967295, %s1510_s18   ;;  %p899_p0 = scmp.ge.s32.totalorder %s1510_s18, 1  ;;  %s1510_s18 = sphi %s1542_s18, %s15_s18  }
   0x2   : > { %p187_p1 = scmp.lt.s32.totalorder %s1510_s18, 3 }
   0x4   : > { %p188_p2 = pnand %p899_p0, %p187_p1 }
   0x5   : > { %v904_v0 = vld [vmem:[%s1927_s1 + $0x80] sm:$0xff] (!%p188_p2)  ;;  %v905_v1 = vld [vmem:[%s1927_s1 + $0x88] sm:$0xff] (!%p188_p2)  ;;  %v906_v2 = vld [vmem:[%s1927_s1 + $0x90] sm:$0xff] (!%p188_p2)  ;;  %p215_p3 = scmp.lt.s32.totalorder (!%p188_p2), %s895_s19, 1  ;;  %v227_v33 = vlaneseq (!%p188_p2) }
   0x6   : > { %191 = sbr.rel (%p188_p2) target bundleno = 604 (0x25c), region = 40  ;;  %v1296_v3 = vpack.c.bf16 (!%p188_p2), %v905_v1, %v904_v0  ;;  %v907_v4 = vld [vmem:[%s1927_s1 + $0x98] sm:$0xff] (!%p188_p2)  ;;  %v908_v6 = vld [vmem:[%s1927_s1 + $0xa0] sm:$0xff] (!%p188_p2)  ;;  %v909_v7 = vld [vmem:[%s1927_s1 + $0xa8] sm:$0xff] (!%p188_p2) }
   0x7   : > { %v1300_v5 = vpack.c.bf16 (!%p188_p2), %v907_v4, %v906_v2  ;;  %v1304_v8 = vpack.c.bf16 (!%p188_p2), %v909_v7, %v908_v6  ;;  %v910_v9 = vld [vmem:[%s1927_s1 + $0xb0] sm:$0xff] (!%p188_p2)  ;;  %v911_v10 = vld [vmem:[%s1927_s1 + $0xb8] sm:$0xff] (!%p188_p2)  ;;  %v912_v14 = vld [vmem:[%s1927_s1 + $0xc0] sm:$0xff] (!%p188_p2)  ;;  %v1648_v41 = vshrl.u32 (!%p188_p2), %v227_v33, 7 }
   0x8   : > { %1297 = vmatprep.subr.bf16.mxu0 (!%p188_p2), %v1296_v3  ;;  %v1308_v13 = vpack.c.bf16 (!%p188_p2), %v911_v10, %v910_v9  ;;  %v913_v15 = vld [vmem:[%s1927_s1 + $0xc8] sm:$0xff] (!%p188_p2)  ;;  %v914_v17 = vld [vmem:[%s1927_s1 + $0xd0] sm:$0xff] (!%p188_p2)  ;;  %v915_v18 = vld [vmem:[%s1927_s1 + $0xd8] sm:$0xff] (!%p188_p2) }
   0x9   : > { %1299 = vmatpush3.bf16.msra.mxu0 (!%p188_p2), %v1296_v3  ;;  %v1312_v16 = vpack.c.bf16 (!%p188_p2), %v913_v15, %v912_v14  ;;  %v939_v19 = vld [vmem:[%s1929_s3 + $0x80] sm:$0xff] (!%p188_p2)  ;;  %v1316_v20 = vpack.c.bf16 (!%p188_p2), %v915_v18, %v914_v17  ;;  %v940_v21 = vld [vmem:[%s1929_s3 + $0x88] sm:$0xff] (!%p188_p2)  ;;  %v941_v22 = vld [vmem:[%s1929_s3 + $0x90] sm:$0xff] (!%p188_p2)  ;;  %vm238_vm0 = vcmp.lt.s32.totalorder (!%p188_p2), %v1648_v41, 1  ;;  %vm230_vm1 = vcmp.ge.s32.totalorder (!%p188_p2), %v1648_v41, 1 }
   0xa   : > { %1301 = vmatprep.subr.bf16.mxu0 (!%p188_p2), %v1300_v5  ;;  %v942_v23 = vld [vmem:[%s1929_s3 + $0x98] sm:$0xff] (!%p188_p2)  ;;  %v916_v24 = vld [vmem:[%s1927_s1 + $0xe0] sm:$0xff] (!%p188_p2)  ;;  %v917_v25 = vld [vmem:[%s1927_s1 + $0xe8] sm:$0xff] (!%p188_p2)  ;;  %v1392_v26 = vpack.c.bf16 (!%p188_p2), %v940_v21, %v939_v19  ;;  %vm245_vm2 = vcmp.lt.s32.totalorder (!%p188_p2), %v1648_v41, 7 }
   0xb   : > { %v1396_v27 = vpack.c.bf16 (!%p188_p2), %v942_v23, %v941_v22  ;;  %v943_v28 = vld [vmem:[%s1929_s3 + $0xa0] sm:$0xff] (!%p188_p2)  ;;  %v944_v29 = vld [vmem:[%s1929_s3 + $0xa8] sm:$0xff] (!%p188_p2)  ;;  %v1320_v30 = vpack.c.bf16 (!%p188_p2), %v917_v25, %v916_v24  ;;  %v918_v31 = vld [vmem:[%s1927_s1 + $0xf0] sm:$0xff] (!%p188_p2) }
   0xc   : > { %1393 = vmatprep.subr.bf16.mxu1 (!%p188_p2), %v1392_v26  ;;  %v919_v32 = vld [vmem:[%s1927_s1 + $0xf8] sm:$0xff] (!%p188_p2)  ;;  %v1400_v34 = vpack.c.bf16 (!%p188_p2), %v944_v29, %v943_v28  ;;  %v945_v35 = vld [vmem:[%s1929_s3 + $0xb0] sm:$0xff] (!%p188_p2)  ;;  %v250_v39 = vld [vmem:[%s1927_s1] sm:$0xff] (!%p188_p2) }
   0xd   : > { %s1933_s19 = smov (!%p215_p3, %s895_s19), 1  ;;  %1303 = vmatpush3.bf16.msra.mxu0 %v1300_v5  ;;  %1395 = vmatpush3.bf16.msra.mxu1 %v1392_v26  ;;  %v946_v36 = vld [vmem:[%s1929_s3 + $0xb8] sm:$0xff]  ;;  %v1324_v38 = vpack.c.bf16 %v919_v32, %v918_v31  ;;  %v251_v40 = vld [vmem:[%s1927_s1 + $0x8] sm:$0xff]  ;;  %v947_v44 = vld [vmem:[%s1929_s3 + $0xc0] sm:$0xff] }
   0xe   : > { %s976_s7 = sshll.u32 %s1933_s19, 4  ;;  %1305 = vmatprep.subr.bf16.mxu0 %v1304_v8  ;;  %1397 = vmatprep.subr.bf16.mxu1 %v1396_v27  ;;  %v1404_v42 = vpack.c.bf16 %v946_v36, %v945_v35  ;;  %v948_v45 = vld [vmem:[%s1929_s3 + $0xc8] sm:$0xff]  ;;  %v1328_v46 = vpack.c.bf16 %v251_v40, %v250_v39  ;;  %v252_v49 = vld [vmem:[%s1927_s1 + $0x10] sm:$0xff]  ;;  %v253_v50 = vld [vmem:[%s1927_s1 + $0x18] sm:$0xff] }
   0xf   : > { %s1576_s10 = scalar_lea.vmem %s1926_s0, %s976_s7  ;;  %v1408_v51 = vpack.c.bf16 %v948_v45, %v947_v44  ;;  %v949_v52 = vld [vmem:[%s1929_s3 + $0xd0] sm:$0xff]  ;;  %v950_v53 = vld [vmem:[%s1929_s3 + $0xd8] sm:$0xff]  ;;  %v1332_v54 = vpack.c.bf16 %v253_v50, %v252_v49  ;;  %v254_v56 = vld [vmem:[%s1927_s1 + $0x20] sm:$0xff]  ;;  %v1786_v45 = vadd.s32 8, %v1648_v41  ;;  %s224_s24 = scalar_lea.vmem %s1931_s5, %s976_s7 }
  0x10   : > { %v1585_v11 = vld [vmem:[%s1576_s10] sm:$0xff]  ;;  %v1640_v37 = vld [vmem:[%s1576_s10 + $0x8] sm:$0xff]  ;;  %v1412_v58 = vpack.c.bf16 %v950_v53, %v949_v52  ;;  %v256_v62 = vld [vmem:[%s1927_s1 + $0x30] sm:$0xff] }
  0x11   : > { %v1588_v12 = vmax.f32 %v1585_v11, 0.0  ;;  %1307 = vmatpush3.bf16.msra.mxu0 %v1304_v8  ;;  %1399 = vmatpush3.bf16.msra.mxu1 %v1396_v27  ;;  %v1651_v43 = vmax.f32 %v1640_v37, 0.0  ;;  %v255_v57 = vld [vmem:[%s1927_s1 + $0x28] sm:$0xff]  ;;  %v951_v59 = vld [vmem:[%s1929_s3 + $0xe0] sm:$0xff]  ;;  %v257_v63 = vld [vmem:[%s1927_s1 + $0x38] sm:$0xff]  ;;  %vm233_vm3 = vcmp.le.s32.totalorder %v1786_v45, 14 }
  0x12   : > { %1309 = vmatprep.subr.bf16.mxu0 %v1308_v13  ;;  %1401 = vmatprep.subr.bf16.mxu1 %v1400_v34  ;;  %v952_v60 = vld [vmem:[%s1929_s3 + $0xe8] sm:$0xff]  ;;  %v1336_v61 = vpack.c.bf16 %v255_v57, %v254_v56  ;;  %v1340_v1 = vpack.c.bf16 %v257_v63, %v256_v62  ;;  %v258_v2 = vld [vmem:[%s1927_s1 + $0x40] sm:$0xff]  ;;  %v260_v5 = vld [vmem:[%s1927_s1 + $0x50] sm:$0xff] }
  0x13   : > { %1118 = vmatprep.mubr.f32.mxu0 %v1588_v12  ;;  %v236_v47 = vrot.slane %v1588_v12, 7  ;;  %v237_v48 = vrot.slane %v1651_v43, 7  ;;  %v1416_v0 = vpack.c.bf16 %v952_v60, %v951_v59  ;;  %v259_v3 = vld [vmem:[%s1927_s1 + $0x48] sm:$0xff]  ;;  %v261_v6 = vld [vmem:[%s1927_s1 + $0x58] sm:$0xff]  ;;  %v262_v8 = vld [vmem:[%s1927_s1 + $0x60] sm:$0xff]  ;;  %v243_v19 = vrot.slane %v1588_v12, 1 }
  0x14   : > { %v1344_v4 = vpack.c.bf16 %v259_v3, %v258_v2  ;;  %v1348_v7 = vpack.c.bf16 %v261_v6, %v260_v5  ;;  %v263_v9 = vld [vmem:[%s1927_s1 + $0x68] sm:$0xff]  ;;  %v265_v14 = vld [vmem:[%s1927_s1 + $0x78] sm:$0xff]  ;;  %v923_v21 = vld [vmem:[%s1927_s1 + $0x110] sm:$0xff] }
  0x15   : > { %1311 = vmatpush3.bf16.msra.mxu0 %v1308_v13  ;;  %1403 = vmatpush3.bf16.msra.mxu1 %v1400_v34  ;;  %v240_v55 = vsel %vm238_vm0, %v237_v48, %v236_v47  ;;  %v1352_v10 = vpack.c.bf16 %v263_v9, %v262_v8  ;;  %v264_v13 = vld [vmem:[%s1927_s1 + $0x70] sm:$0xff]  ;;  %v922_v17 = vld [vmem:[%s1927_s1 + $0x108] sm:$0xff]  ;;  %v924_v22 = vld [vmem:[%s1927_s1 + $0x118] sm:$0xff]  ;;  %v239_v23 = vsel %vm238_vm0, %v236_v47, %v237_v48 }
  0x16   : > { %1313 = vmatprep.subr.bf16.mxu0 %v1312_v16  ;;  %1405 = vmatprep.subr.bf16.mxu1 %v1404_v42  ;;  %v1356_v15 = vpack.c.bf16 %v265_v14, %v264_v13  ;;  %v1364_v24 = vpack.c.bf16 %v924_v22, %v923_v21  ;;  %v925_v26 = vld [vmem:[%s1927_s1 + $0x120] sm:$0xff]  ;;  %v926_v27 = vld [vmem:[%s1927_s1 + $0x128] sm:$0xff]  ;;  %v927_v28 = vld [vmem:[%s1927_s1 + $0x130] sm:$0xff] }
  0x17   : > { %v1368_v12 = vpack.c.bf16 %v926_v27, %v925_v26  ;;  %v928_v29 = vld [vmem:[%s1927_s1 + $0x138] sm:$0xff]  ;;  %v929_v31 = vld [vmem:[%s1927_s1 + $0x140] sm:$0xff]  ;;  %v930_v32 = vld [vmem:[%s1927_s1 + $0x148] sm:$0xff] }
  0x18   : > { %v1376_v33 = vpack.c.bf16 %v930_v32, %v929_v31  ;;  %v931_v34 = vld [vmem:[%s1927_s1 + $0x150] sm:$0xff]  ;;  %v932_v35 = vld [vmem:[%s1927_s1 + $0x158] sm:$0xff]  ;;  %v934_v39 = vld [vmem:[%s1927_s1 + $0x168] sm:$0xff] }
  0x19   : > { %1315 = vmatpush3.bf16.msra.mxu0 %v1312_v16  ;;  %1407 = vmatpush3.bf16.msra.mxu1 %v1404_v42  ;;  %v921_v16 = vld [vmem:[%s1927_s1 + $0x100] sm:$0xff]  ;;  %v1380_v36 = vpack.c.bf16 %v932_v35, %v931_v34  ;;  %v935_v42 = vld [vmem:[%s1927_s1 + $0x170] sm:$0xff]  ;;  %v954_v48 = vld [vmem:[%s1929_s3 + $0xf8] sm:$0xff] }
  0x1a   : > { %1317 = vmatprep.subr.bf16.mxu0 %v1316_v20  ;;  %1409 = vmatprep.subr.bf16.mxu1 %v1408_v51  ;;  %v1360_v18 = vpack.c.bf16 %v922_v17, %v921_v16  ;;  %v953_v47 = vld [vmem:[%s1929_s3 + $0xf0] sm:$0xff]  ;;  %v550_v50 = vld [vmem:[%s1929_s3] sm:$0xff]  ;;  %v553_v59 = vld [vmem:[%s1929_s3 + $0x18] sm:$0xff] }
  0x1b   : > { %v1420_v49 = vpack.c.bf16 %v954_v48, %v953_v47  ;;  %v938_v53 = vld [vmem:[%s1928_s2] ss:$0 sm:$0xff]  ;;  %v557_v13 = vld [vmem:[%s1929_s3 + $0x38] sm:$0xff]  ;;  %v559_v41 = vld [vmem:[%s1929_s3 + $0x48] sm:$0xff] }
  0x1c   : > { %v554_v3 = vld [vmem:[%s1929_s3 + $0x20] sm:$0xff]  ;;  %v560_v17 = vld [vmem:[%s1929_s3 + $0x50] sm:$0xff]  ;;  %v563_v21 = vld [vmem:[%s1929_s3 + $0x68] sm:$0xff] }
  0x1d   : > { %1319 = vmatpush3.bf16.msra.mxu0 %v1316_v20  ;;  %1411 = vmatpush3.bf16.msra.mxu1 %v1408_v51  ;;  %v244_v20 = vrot.slane %v1651_v43, 1  ;;  %v551_v51 = vld [vmem:[%s1929_s3 + $0x8] sm:$0xff]  ;;  %v956_v26 = vld [vmem:[%s1929_s3 + $0x100] sm:$0xff]  ;;  %v962_v34 = vld [vmem:[%s1929_s3 + $0x130] sm:$0xff] }
  0x1e   : > { %1321 = vmatprep.subr.bf16.mxu0 %v1320_v30  ;;  %1413 = vmatprep.subr.bf16.mxu1 %v1412_v58  ;;  %v1424_v52 = vpack.c.bf16 %v551_v51, %v550_v50  ;;  %v957_v27 = vld [vmem:[%s1929_s3 + $0x108] sm:$0xff]  ;;  %v960_v31 = vld [vmem:[%s1929_s3 + $0x120] sm:$0xff]  ;;  %v963_v35 = vld [vmem:[%s1929_s3 + $0x138] sm:$0xff] }
  0x1f   : > { %v246_v25 = vsel %vm245_vm2, %v243_v19, %v244_v20  ;;  %v961_v32 = vld [vmem:[%s1929_s3 + $0x128] sm:$0xff]  ;;  %v971_v50 = vld [vmem:[%s1929_s3 + $0x178] sm:$0xff] }
  0x20   : > { %v969_v47 = vld [vmem:[%s1929_s3 + $0x168] sm:$0xff] }
  0x21   : > { %1323 = vmatpush3.bf16.msra.mxu0 %v1320_v30  ;;  %1415 = vmatpush3.bf16.msra.mxu1 %v1412_v58  ;;  %v1372_v30 = vpack.c.bf16 %v928_v29, %v927_v28  ;;  %v552_v58 = vld [vmem:[%s1929_s3 + $0x10] sm:$0xff]  ;;  %v959_v29 = vld [vmem:[%s1929_s3 + $0x118] sm:$0xff] }
  0x22   : > { %1325 = vmatprep.subr.bf16.mxu0 %v1324_v38  ;;  %1417 = vmatprep.subr.bf16.mxu1 %v1416_v0  ;;  %v958_v28 = vld [vmem:[%s1929_s3 + $0x110] sm:$0xff] }
  0x25   : > { %1327 = vmatpush3.bf16.msra.mxu0 %v1324_v38  ;;  %1419 = vmatpush3.bf16.msra.mxu1 %v1416_v0  ;;  %v933_v38 = vld [vmem:[%s1927_s1 + $0x160] sm:$0xff]  ;;  %v1428_v0 = vpack.c.bf16 %v553_v59, %v552_v58 }
  0x26   : > { %1329 = vmatprep.subr.bf16.mxu0 %v1328_v46  ;;  %v1384_v40 = vpack.c.bf16 %v934_v39, %v933_v38  ;;  %1421 = vmatprep.subr.bf16.mxu1 %v1420_v49  ;;  %v964_v38 = vld [vmem:[%s1929_s3 + $0x140] sm:$0xff]  ;;  %v965_v39 = vld [vmem:[%s1929_s3 + $0x148] sm:$0xff] }
  0x28   : > { %1119 = vmatmul.mubr.f32.vlgmr.msra.gmra.mrb[0].mxu0 %v1651_v43  ;;  %v936_v43 = vld [vmem:[%s1927_s1 + $0x178] sm:$0xff] }
  0x29   : > { %1331 = vmatpush3.bf16.msra.mxu0 %v1328_v46  ;;  %1153 = vmatprep.mubr.msk.f32.mxu0 %vm230_vm1, %v240_v55  ;;  %v1388_v44 = vpack.c.bf16 %v936_v43, %v935_v42  ;;  %v247_v46 = vsel %vm245_vm2, %v244_v20, %v243_v19  ;;  %v562_v20 = vld [vmem:[%s1929_s3 + $0x60] sm:$0xff]  ;;  %v966_v42 = vld [vmem:[%s1929_s3 + $0x150] sm:$0xff]  ;;  %v967_v43 = vld [vmem:[%s1929_s3 + $0x158] sm:$0xff] }
  0x2a   : > { %1333 = vmatprep.subr.bf16.mxu0 %v1332_v54  ;;  %1423 = vmatpush3.bf16.msra.mxu1 %v1420_v49  ;;  %v1448_v22 = vpack.c.bf16 %v563_v21, %v562_v20  ;;  %v970_v49 = vld [vmem:[%s1929_s3 + $0x170] sm:$0xff] }
  0x2b   : > { %1425 = vmatprep.subr.bf16.mxu1 %v1424_v52  ;;  %v1484_v51 = vpack.c.bf16 %v971_v50, %v970_v49 }
  0x2d   : > { %1335 = vmatpush3.bf16.msra.mxu0 %v1332_v54 }
  0x2e   : > { %1337 = vmatprep.subr.bf16.mxu0 %v1336_v61 }
  0x31   : > { %1339 = vmatpush3.bf16.msra.mxu0 %v1336_v61 }
  0x32   : > { %1341 = vmatprep.subr.bf16.mxu0 %v1340_v1 }
  0x35   : > { %1343 = vmatpush3.bf16.msra.mxu0 %v1340_v1 }
  0x36   : > { %1345 = vmatprep.subr.bf16.mxu0 %v1344_v4 }
  0x39   : > { %1347 = vmatpush3.bf16.msra.mxu0 %v1344_v4  ;;  %v555_v4 = vld [vmem:[%s1929_s3 + $0x28] sm:$0xff] }
  0x3a   : > { %1349 = vmatprep.subr.bf16.mxu0 %v1348_v7  ;;  %v1432_v9 = vpack.c.bf16 %v555_v4, %v554_v3 }
  0x3d   : > { %1351 = vmatpush3.bf16.msra.mxu0 %v1348_v7 }
  0x3e   : > { %1353 = vmatprep.subr.bf16.mxu0 %v1352_v10 }
  0x41   : > { %1355 = vmatpush3.bf16.msra.mxu0 %v1352_v10  ;;  %v556_v10 = vld [vmem:[%s1929_s3 + $0x30] sm:$0xff] }
  0x42   : > { %1357 = vmatprep.subr.bf16.mxu0 %v1356_v15  ;;  %v1436_v14 = vpack.c.bf16 %v557_v13, %v556_v10 }
  0x45   : > { %1359 = vmatpush3.bf16.msra.mxu0 %v1356_v15  ;;  %v558_v15 = vld [vmem:[%s1929_s3 + $0x40] sm:$0xff] }
  0x46   : > { %1361 = vmatprep.subr.bf16.mxu0 %v1360_v18  ;;  %v1440_v16 = vpack.c.bf16 %v559_v41, %v558_v15 }
  0x48   : > { %1154 = vmatmul.mubr.f32.vlgmr.msra.gmra.mrb[0].mxu0 %v239_v23  ;;  %v564_v23 = vld [vmem:[%s1929_s3 + $0x70] sm:$0xff] }
  0x49   : > { %1363 = vmatpush3.bf16.msra.mxu0 %v1360_v18  ;;  %1188 = vmatprep.mubr.f32.mxu0 %v246_v25  ;;  %v561_v18 = vld [vmem:[%s1929_s3 + $0x58] sm:$0xff] }
  0x4a   : > { %1365 = vmatprep.subr.bf16.mxu0 %v1364_v24  ;;  %v1444_v19 = vpack.c.bf16 %v561_v18, %v560_v17 }
  0x4d   : > { %1367 = vmatpush3.bf16.msra.mxu0 %v1364_v24  ;;  %v565_v24 = vld [vmem:[%s1929_s3 + $0x78] sm:$0xff] }
  0x4e   : > { %1369 = vmatprep.subr.bf16.mxu0 %v1368_v12  ;;  %v1452_v25 = vpack.c.bf16 %v565_v24, %v564_v23 }
  0x51   : > { %1371 = vmatpush3.bf16.msra.mxu0 %v1368_v12  ;;  %v1456_v12 = vpack.c.bf16 %v957_v27, %v956_v26 }
  0x52   : > { %1373 = vmatprep.subr.bf16.mxu0 %v1372_v30 }
  0x55   : > { %1375 = vmatpush3.bf16.msra.mxu0 %v1372_v30  ;;  %v1460_v30 = vpack.c.bf16 %v959_v29, %v958_v28 }
  0x56   : > { %1377 = vmatprep.subr.bf16.mxu0 %v1376_v33 }
  0x59   : > { %1379 = vmatpush3.bf16.msra.mxu0 %v1376_v33  ;;  %v1464_v33 = vpack.c.bf16 %v961_v32, %v960_v31 }
  0x5a   : > { %1381 = vmatprep.subr.bf16.mxu0 %v1380_v36 }
  0x5d   : > { %1383 = vmatpush3.bf16.msra.mxu0 %v1380_v36  ;;  %v1468_v36 = vpack.c.bf16 %v963_v35, %v962_v34 }
  0x5e   : > { %1385 = vmatprep.subr.bf16.mxu0 %v1384_v40 }
  0x61   : > { %1387 = vmatpush3.bf16.msra.mxu0 %v1384_v40  ;;  %v1472_v40 = vpack.c.bf16 %v965_v39, %v964_v38 }
  0x62   : > { %1389 = vmatprep.subr.bf16.mxu0 %v1388_v44 }
  0x65   : > { %1391 = vmatpush3.bf16.msra.mxu0 %v1388_v44  ;;  %v1476_v44 = vpack.c.bf16 %v967_v43, %v966_v42 }
  0x68   : > { %1189 = vmatmul.mubr.msk.f32.vlgmr.msra.gmra.mrb[0].mxu0 %vm233_vm3, %v247_v46  ;;  %v968_v46 = vld [vmem:[%s1929_s3 + $0x160] sm:$0xff] }
  0x69   : > { %v1480_v48 = vpack.c.bf16 %v969_v47, %v968_v46 }
 0x13b   : > { %v1190_v54 = vpop.f32.mrb[0].mxu0 }
 0x13c   : > { %v535_v55 = vadd.f32 %v1190_v54, %v938_v53  ;;  %v516_v56 = vpop.f32.mrb[1].mxu0 }
 0x13d   : > { %v534_v57 = vadd.f32 %v938_v53, %v516_v56 }
 0x13e   : > { %v537_v60 = vmax.f32 %v535_v55, 0.0 }
 0x13f   : > { %v536_v61 = vmax.f32 %v534_v57, 0.0 }
 0x140   : > { %v539_v62 = vrot.slane %v537_v60, 7  ;;  %v545_v63 = vrot.slane %v537_v60, 1 }
 0x141   : > { %v538_v1 = vrot.slane %v536_v61, 7  ;;  %v544_v2 = vrot.slane %v536_v61, 1  ;;  %1223 = vmatprep.mubr.f32.mxu1 %v536_v61 }
 0x142   : > { %1224 = vmatmul.mubr.f32.vlgmr.msra.gmra.mrb[0].mxu1 %v537_v60 }
 0x143   : > { %1427 = vmatpush3.bf16.msra.mxu1 %v1424_v52  ;;  %v541_v5 = vsel %vm238_vm0, %v539_v62, %v538_v1  ;;  %v540_v6 = vsel %vm238_vm0, %v538_v1, %v539_v62  ;;  %v546_v7 = vsel %vm245_vm2, %v544_v2, %v545_v63  ;;  %v1828_v8 = vsel %vm245_vm2, %v545_v63, %v544_v2  ;;  %v973_v52 = vld [vmem:[%s1930_s4] ss:$0 sm:$0xff] }
 0x144   : > { %1258 = vmatprep.mubr.msk.f32.mxu1 %vm230_vm1, %v541_v5  ;;  %1429 = vmatprep.subr.bf16.mxu1 %v1428_v0 }
 0x147   : > { %1431 = vmatpush3.bf16.msra.mxu1 %v1428_v0 }
 0x148   : > { %1433 = vmatprep.subr.bf16.mxu1 %v1432_v9 }
 0x14b   : > { %1435 = vmatpush3.bf16.msra.mxu1 %v1432_v9 }
 0x14c   : > { %1437 = vmatprep.subr.bf16.mxu1 %v1436_v14 }
 0x14f   : > { %1439 = vmatpush3.bf16.msra.mxu1 %v1436_v14 }
 0x150   : > { %1441 = vmatprep.subr.bf16.mxu1 %v1440_v16 }
 0x153   : > { %1443 = vmatpush3.bf16.msra.mxu1 %v1440_v16 }
 0x154   : > { %1445 = vmatprep.subr.bf16.mxu1 %v1444_v19 }
 0x157   : > { %1447 = vmatpush3.bf16.msra.mxu1 %v1444_v19 }
 0x158   : > { %1449 = vmatprep.subr.bf16.mxu1 %v1448_v22 }
 0x15b   : > { %1451 = vmatpush3.bf16.msra.mxu1 %v1448_v22 }
 0x15c   : > { %1453 = vmatprep.subr.bf16.mxu1 %v1452_v25 }
 0x15f   : > { %1455 = vmatpush3.bf16.msra.mxu1 %v1452_v25 }
 0x160   : > { %1457 = vmatprep.subr.bf16.mxu1 %v1456_v12 }
 0x162   : > { %1259 = vmatmul.mubr.f32.vlgmr.msra.gmra.mrb[0].mxu1 %v540_v6 }
 0x163   : > { %1459 = vmatpush3.bf16.msra.mxu1 %v1456_v12  ;;  %1293 = vmatprep.mubr.f32.mxu1 %v546_v7 }
 0x164   : > { %1461 = vmatprep.subr.bf16.mxu1 %v1460_v30 }
 0x167   : > { %1463 = vmatpush3.bf16.msra.mxu1 %v1460_v30 }
 0x168   : > { %1465 = vmatprep.subr.bf16.mxu1 %v1464_v33 }
 0x16b   : > { %1467 = vmatpush3.bf16.msra.mxu1 %v1464_v33 }
 0x16c   : > { %1469 = vmatprep.subr.bf16.mxu1 %v1468_v36 }
 0x16f   : > { %1471 = vmatpush3.bf16.msra.mxu1 %v1468_v36 }
 0x170   : > { %1473 = vmatprep.subr.bf16.mxu1 %v1472_v40 }
 0x173   : > { %1475 = vmatpush3.bf16.msra.mxu1 %v1472_v40 }
 0x174   : > { %1477 = vmatprep.subr.bf16.mxu1 %v1476_v44 }
 0x177   : > { %1479 = vmatpush3.bf16.msra.mxu1 %v1476_v44 }
 0x178   : > { %1481 = vmatprep.subr.bf16.mxu1 %v1480_v48 }
 0x17b   : > { %1483 = vmatpush3.bf16.msra.mxu1 %v1480_v48 }
 0x17c   : > { %1485 = vmatprep.subr.bf16.mxu1 %v1484_v51 }
 0x17f   : > { %1487 = vmatpush3.bf16.msra.mxu1 %v1484_v51 }
 0x182   : > { %1294 = vmatmul.mubr.msk.f32.vlgmr.msra.gmra.mrb[0].mxu1 %vm233_vm3, %v1828_v8 }
 0x255   : > { %v1295_v53 = vpop.f32.mrb[0].mxu1 }
 0x256   : > { %v835_v54 = vadd.f32 %v1295_v53, %v973_v52  ;;  %v816_v55 = vpop.f32.mrb[1].mxu1 }
 0x257   : > { %v834_v56 = vadd.f32 %v973_v52, %v816_v55 }
 0x258   : > { %v837_v57 = vadd.f32 %v835_v54, %v1640_v37 }
 0x259   : > { %v836_v58 = vadd.f32 %v834_v56, %v1585_v11 }
 0x25a   : > { %839 = vst [vmem:[%s224_s24 + $0x8] sm:$0xff] %v837_v57 }
 0x25b   : > { %838 = vst [vmem:[%s224_s24] sm:$0xff] %v836_v58 }
 0x25c PF: > { %s15_s18 = sadd.s32 1, %s1510_s18  }
 0x25d   : > { %p12_p4 = scmp.ge.s32.totalorder %s15_s18, 4  }
 0x25f   :  { %14 = sbr.rel (!%p12_p4) target bundleno = 1 (0x1), region = 74 }

</bundles_post_ra>
